<compile_context>
chip_gen: v6e
topology: v6e:2x2x1
jax: 0.10.0
libtpu: 0.0.40
codegen_flags: <defaults>
</compile_context>

<pallas_src>
import math
from functools import partial

import jax
import jax.numpy as jnp
from jax.experimental import pallas as pl
from jax.experimental.pallas import tpu as pltpu


def _build_pe(d_model: int, max_len: int) -> jnp.ndarray:
    """Buffer setup (glue, plain JAX) -- identical to the PyTorch __init__."""
    position = jnp.arange(max_len, dtype=jnp.float32)
    div_term = jnp.exp(
        jnp.arange(0, d_model, 2, dtype=jnp.float32) * (-math.log(10000.0) / d_model)
    )
    angles = position[:, None] * div_term[None, :]
    pe = jnp.zeros((1, max_len, d_model), dtype=jnp.float32)
    pe = pe.at[0, :, 0::2].set(jnp.sin(angles))
    pe = pe.at[0, :, 1::2].set(jnp.cos(angles))
    return pe


def _largest_divisor_tile(n: int, align: int, max_tile: int) -> int:
    """Largest divisor of n that is a multiple of `align` and <= max_tile.

    Falls back to n (full dimension) when n is small or cannot be tiled without
    violating the (8, 128) block-shape rule.
    """
    if n <= max_tile:
        return n
    if n % align != 0:
        return n
    best = align
    t = align
    while t <= max_tile:
        if n % t == 0:
            best = t
        t += align
    return best


def _pe_dropout_kernel(seed_ref, x_ref, pe_ref, o_ref, *, keep_prob: float, sd: int):
    """Fused positional-encoding add + inverted dropout on a (tb, tc) tile.

    Dropout mask is a stateless counter-based hash of the *global* element index,
    so it is deterministic for a given seed and independent of the tiling.
    """
    i = pl.program_id(0)          # row (batch) tile index
    j = pl.program_id(1)          # column (flattened seq*d_model) tile index
    tb, tc = x_ref.shape

    y = x_ref[...] + pe_ref[...]  # (tb, tc) + (1, tc) broadcast over batch rows

    # Global element id for each lane of the tile.
    row = jax.lax.broadcasted_iota(jnp.int32, (tb, tc), 0) + i * tb
    col = jax.lax.broadcasted_iota(jnp.int32, (tb, tc), 1) + j * tc
    idx = (row * sd + col).astype(jnp.uint32)

    # lowbias32-style integer hash (pure VPU ops; portable to interpret mode).
    h = idx * jnp.uint32(0x9E3779B1) + seed_ref[0].astype(jnp.uint32)
    h = h ^ (h >> 16)
    h = h * jnp.uint32(0x7FEB352D)
    h = h ^ (h >> 15)
    h = h * jnp.uint32(0x846CA68B)
    h = h ^ (h >> 16)

    # Direct unsigned threshold compare; scale folded into the select.
    thresh = jnp.uint32(min(int(round(keep_prob * 2.0**32)), 2**32 - 1))
    scale = jnp.where(h < thresh, jnp.float32(1.0 / keep_prob), jnp.float32(0.0))
    o_ref[...] = (y * scale).astype(o_ref.dtype)


def positional_encoding_forward(x: jnp.ndarray,
                                pe: jnp.ndarray,
                                *,
                                dropout_p: float = 0.1,
                                training: bool = True,
                                seed: int = 0) -> jnp.ndarray:
    """Pallas implementation of PositionalEncoding.forward.

    x : (B, S, D), with S == pe.shape[1] (== max_len) and D == pe.shape[2].
    """
    B, S, D = x.shape
    assert pe.shape == (1, S, D), "pe must be (1, S, D) with S == max_len"
    keep_prob = 1.0 if (not training or dropout_p == 0.0) else 1.0 - dropout_p

    if keep_prob >= 1.0:
        # Eval / p == 0: pure broadcast add; XLA fuses this at the HBM roofline,
        # a pallas_call would only add per-step overhead.
        return x + pe.astype(x.dtype)

    # Lane-dense flattened layout: last dim S*D is a multiple of 128 whenever
    # D or S*D is, giving unmasked full-lane stores.
    SD = S * D
    x2 = x.reshape(B, SD)
    pe2 = pe.reshape(1, SD).astype(x.dtype)

    # Tile selection: column tiles are multiples of 128 (or full SD); row tiles
    # keep each block around <= 2 MiB so double-buffered x + out blocks stay well
    # inside scoped VMEM on v5e (16 MiB) / v6e (32 MiB) / v7x (32 MiB).
    tc = _largest_divisor_tile(SD, 128, 16384)
    max_rows = max(1, (2 * 1024 * 1024) // (tc * x.dtype.itemsize))
    tb = _largest_divisor_tile(B, 8, max_rows)
    grid = (B // tb, SD // tc)

    seed_arr = jnp.array([seed], dtype=jnp.int32)
    kernel = partial(_pe_dropout_kernel, keep_prob=keep_prob, sd=SD)

    out2 = pl.pallas_call(
        kernel,
        out_shape=jax.ShapeDtypeStruct((B, SD), x.dtype),
        grid_spec=pltpu.PrefetchScalarGridSpec(
            num_scalar_prefetch=1,                                   # seed -> SMEM
            grid=grid,
            in_specs=[
                pl.BlockSpec((tb, tc), lambda i, j, seed: (i, j)),   # x tile
                pl.BlockSpec((1, tc), lambda i, j, seed: (0, j)),    # pe (batch-broadcast)
            ],
            out_specs=pl.BlockSpec((tb, tc), lambda i, j, seed: (i, j)),
        ),
        compiler_params=pltpu.CompilerParams(
            dimension_semantics=("parallel", "parallel")),           # stateless mask
    )(seed_arr, x2, pe2)

    return out2.reshape(B, S, D)


if __name__ == "__main__":
    # Small shapes consistent with the module: batch=2, seq=max_len=8, d_model=32.
    B, S, D = 2, 8, 32
    key = jax.random.PRNGKey(0)
    x = jax.random.normal(key, (B, S, D), dtype=jnp.float32)
    pe = _build_pe(d_model=D, max_len=S)

    # 1) Eval-mode path: must match x + pe exactly (wrapper bypasses Pallas).
    out_eval = jax.block_until_ready(
        positional_encoding_forward(x, pe, dropout_p=0.1, training=False))
    assert jnp.allclose(out_eval, x + pe, atol=1e-6), "PE add mismatch"

    # 2) Training-mode path: Pallas kernel (fused add + inverted dropout),
    #    deterministic given the seed.
    out_train = jax.block_until_ready(
        positional_encoding_forward(x, pe, dropout_p=0.1, training=True, seed=42))
    ref = x + pe
    kept = out_train != 0
    # Surviving elements are (x+pe)/keep_prob; dropped elements are exactly 0.
    assert jnp.allclose(jnp.where(kept, out_train, 0.0),
                        jnp.where(kept, ref / 0.9, 0.0), atol=1e-5)
    # Sanity: dropout actually dropped something but kept the majority.
    frac_kept = float(jnp.mean(kept.astype(jnp.float32)))
    assert 0.5 < frac_kept < 1.0, f"unexpected keep fraction {frac_kept}"

    print("KERNEL_OK")
</pallas_src>

<mosaic_0001>
module attributes {stable_mosaic.version = 11 : i64} {
  func.func @_pe_dropout_kernel(%arg0: i32, %arg1: i32, %arg2: memref<1xi32, #tpu.memory_space<smem>>, %arg3: memref<2x256xf32, #tpu.memory_space<vmem>>, %arg4: memref<1x256xf32, #tpu.memory_space<vmem>>, %arg5: memref<2x256xf32, #tpu.memory_space<vmem>>) attributes {dimension_semantics = [#tpu.dimension_semantics<parallel>, #tpu.dimension_semantics<parallel>], iteration_bounds = array<i64: 1, 1>, scalar_prefetch = 1 : i64, scratch_operands = 0 : i64, tpu.core_type = #tpu.core_type<tc>, window_params = [{transform_indices = @transform_0, window_bounds = array<i64: 2, 256>}, {transform_indices = @transform_1, window_bounds = array<i64: 1, 256>}, {transform_indices = @transform_2, window_bounds = array<i64: 2, 256>}]} {
    %c0 = arith.constant 0 : index
    %c0_0 = arith.constant 0 : index
    %0 = vector.load %arg3[%c0, %c0_0] : memref<2x256xf32, #tpu.memory_space<vmem>>, vector<2x256xf32>
    %c0_1 = arith.constant 0 : index
    %c0_2 = arith.constant 0 : index
    %1 = vector.load %arg4[%c0_1, %c0_2] : memref<1x256xf32, #tpu.memory_space<vmem>>, vector<1x256xf32>
    %2 = vector.broadcast %1 : vector<1x256xf32> to vector<2x256xf32>
    %3 = arith.addf %0, %2 : vector<2x256xf32>
    %4 = tpu.iota {dimensions = array<i32: 0>} : vector<2x256xi32>
    %c2_i32 = arith.constant 2 : i32
    %5 = arith.muli %arg0, %c2_i32 : i32
    %6 = vector.broadcast %5 : i32 to vector<2x256xi32>
    %7 = arith.addi %4, %6 : vector<2x256xi32>
    %8 = tpu.iota {dimensions = array<i32: 1>} : vector<2x256xi32>
    %c256_i32 = arith.constant 256 : i32
    %9 = arith.muli %arg1, %c256_i32 : i32
    %10 = vector.broadcast %9 : i32 to vector<2x256xi32>
    %11 = arith.addi %8, %10 : vector<2x256xi32>
    %c256_i32_3 = arith.constant 256 : i32
    %12 = vector.broadcast %c256_i32_3 : i32 to vector<2x256xi32>
    %13 = arith.muli %7, %12 : vector<2x256xi32>
    %14 = arith.addi %13, %11 : vector<2x256xi32>
    %c-1640531535_i32 = arith.constant -1640531535 : i32
    %15 = vector.broadcast %c-1640531535_i32 : i32 to vector<2x256xi32>
    %16 = arith.muli %14, %15 : vector<2x256xi32>
    %c0_4 = arith.constant 0 : index
    %17 = memref.load %arg2[%c0_4] : memref<1xi32, #tpu.memory_space<smem>>
    %18 = vector.broadcast %17 : i32 to vector<2x256xi32>
    %19 = arith.addi %16, %18 : vector<2x256xi32>
    %c16_i32 = arith.constant 16 : i32
    %20 = vector.broadcast %c16_i32 : i32 to vector<2x256xi32>
    %21 = arith.shrui %19, %20 : vector<2x256xi32>
    %22 = arith.xori %19, %21 : vector<2x256xi32>
    %c2146121005_i32 = arith.constant 2146121005 : i32
    %23 = vector.broadcast %c2146121005_i32 : i32 to vector<2x256xi32>
    %24 = arith.muli %22, %23 : vector<2x256xi32>
    %c15_i32 = arith.constant 15 : i32
    %25 = vector.broadcast %c15_i32 : i32 to vector<2x256xi32>
    %26 = arith.shrui %24, %25 : vector<2x256xi32>
    %27 = arith.xori %24, %26 : vector<2x256xi32>
    %c-2073254261_i32 = arith.constant -2073254261 : i32
    %28 = vector.broadcast %c-2073254261_i32 : i32 to vector<2x256xi32>
    %29 = arith.muli %27, %28 : vector<2x256xi32>
    %c16_i32_5 = arith.constant 16 : i32
    %30 = vector.broadcast %c16_i32_5 : i32 to vector<2x256xi32>
    %31 = arith.shrui %29, %30 : vector<2x256xi32>
    %32 = arith.xori %29, %31 : vector<2x256xi32>
    %c-429496730_i32 = arith.constant -429496730 : i32
    %33 = vector.broadcast %c-429496730_i32 : i32 to vector<2x256xi32>
    %34 = arith.cmpi ult, %32, %33 : vector<2x256xi32>
    %cst = arith.constant 1.11111116 : f32
    %cst_6 = arith.constant 0.000000e+00 : f32
    %35 = vector.broadcast %cst : f32 to vector<2x256xf32>
    %36 = vector.broadcast %cst_6 : f32 to vector<2x256xf32>
    %37 = arith.select %34, %35, %36 : vector<2x256xi1>, vector<2x256xf32>
    %38 = arith.mulf %3, %37 : vector<2x256xf32>
    %c0_7 = arith.constant 0 : index
    %c0_8 = arith.constant 0 : index
    %39 = vector.load %arg5[%c0_7, %c0_8] : memref<2x256xf32, #tpu.memory_space<vmem>>, vector<2x256xf32>
    tpu.vector_store %arg5[%c0_7, %c0_8], %38 {strides = array<i32>} : memref<2x256xf32, #tpu.memory_space<vmem>>, vector<2x256xf32>,
    return
  }
  func.func @transform_0(%arg0: i32, %arg1: i32, %arg2: memref<1xi32, #tpu.memory_space<smem>>) -> (i32, i32) {
    %c0_i32 = arith.constant 0 : i32
    return %arg0, %arg1 : i32, i32
  }
  func.func @transform_1(%arg0: i32, %arg1: i32, %arg2: memref<1xi32, #tpu.memory_space<smem>>) -> (i32, i32) {
    %c0_i32 = arith.constant 0 : i32
    %c0_i32_0 = arith.constant 0 : i32
    return %c0_i32, %arg1 : i32, i32
  }
  func.func @transform_2(%arg0: i32, %arg1: i32, %arg2: memref<1xi32, #tpu.memory_space<smem>>) -> (i32, i32) {
    %c0_i32 = arith.constant 0 : i32
    return %arg0, %arg1 : i32, i32
  }
}

</mosaic_0001>

<bundles_post_ra>
// kernel: tpu_custom_call.1
= control target key start
LH: loop header
LB: loop body
LE: loop exit
PB: predicated region body
PF: predicated region fallthrough
CT: control target
= control target key end

     0   :  { %9 = vsyncpa [#allocation5], 0  ;;  %s200_s0 = inlined_call_operand.<no memory space> [shape: s32[1], index: 0, kind: input, shape index: {}]   ;;  %s201_s1 = inlined_call_operand.hbm [shape: f32[2,256], index: 1, kind: input, shape index: {}]   ;;  %s202_s2 = inlined_call_operand.vmem [shape: f32[1,256], index: 2, kind: input, shape index: {}]   ;;  %s203_s3 = inlined_call_operand.hbm [shape: f32[2,256], index: 3, kind: output, shape index: {}]  }
   0x1   :  { %10 = vsyncpa [#allocation6], 0  ;;  %s164_s12 = smov [#allocation4]  }
   0x2   :  { %s17_s13 = sshll.u32 %s164_s12, 4  ;;  %s18_s13 = int_to_ptr.vmem [resolvable:$true] %s17_s13 }
   0x3   :  { %s128_s14 = scalar_lea.vmem %s18_s13, 64  ;;  %p133_p1 = scmp.lt.s32.totalorder %s18_s13, %s18_s13 }
   0x4   :  { %p129_p0 = scmp.ne.s32.totalorder %s18_s13, %s128_s14  ;;  %p134_p2 = scmp.lt.s32.totalorder %s128_s14, %s128_s14 }
   0x6   :  { %p135_p3 = por %p134_p2, %p133_p1 }
   0x8   :  { %p136_p4 = pnand %p135_p3, %p129_p0 }
   0xa   :  { %139 = shalt.err (!%p136_p4)
}
   0xb   :  { %20 = dma.hbm_to_vmem [thread:$0]  %s201_s1, 64, %s18_s13, [#allocation5]  }
   0xc   :  { %160 = dma.done.wait [#allocation5], 64  }
   0xd   :  { %161 = vsyncadd [#allocation5], 4294967232  ;;  %v29_v0 = vlaneseq  ;;  %v65_v7 = vstv %s200_s0  ;;  %v165_v14 = vmov 1983009808   ;;  %v27_v20 = vld [vmem:[%s202_s2] sm:$0x3] }
   0xe   :  { %v39_v15 = vunpack.c.l.s4 %v165_v14  ;;  %v26_v39 = vld [vmem:[#allocation4] sm:$0xf]  ;;  %v166_v40 = vmov 0.0   ;;  %s167_s0 = smov [#allocation7]  }
   0xf   :  { %v30_v1 = vshrl.u32 %v29_v0, 7  ;;  %v53_v2 = vand.u32 127, %v29_v0  ;;  %s107_s2 = sshll.u32 %s167_s0, 4  ;;  %s108_s2 = int_to_ptr.vmem [resolvable:$true] %s107_s2 }
  0x10   :  { %v40_v23 = vunpack.c.0.s8 %v39_v15  ;;  %s140_s20 = scalar_lea.vmem %s108_s2, 64  ;;  %p145_p6 = scmp.lt.s32.totalorder %s108_s2, %s108_s2 }
  0x11   :  { %v54_v3 = vadd.s32 128, %v53_v2  ;;  %v59_v4 = vmul.u32 256, %v30_v1  ;;  %v31_v16 = vsub.s32 0, %v30_v1  ;;  %v35_v17 = vsub.s32 1, %v30_v1  ;;  %p141_p5 = scmp.ne.s32.totalorder %s108_s2, %s140_s20  ;;  %p146_p7 = scmp.lt.s32.totalorder %s140_s20, %s140_s20 }
  0x12   :  { %v43_v31 = vsub.s32 %v40_v23, %v30_v1 }
  0x13   :  { %v60_v5 = vadd.s32 %v59_v4, %v53_v2  ;;  %v61_v6 = vadd.s32 %v59_v4, %v54_v3  ;;  %v32_v24 = vrot.slane %v27_v20, %v31_v16  ;;  %v36_v25 = vrot.slane %v27_v20, %v35_v17  ;;  %p147_p8 = por %p146_p7, %p145_p6 }
  0x15   :  { %v62_v8 = vmul.u32 2654435761, %v60_v5  ;;  %v63_v9 = vmul.u32 2654435761, %v61_v6  ;;  %v37_v30 = vcombine.low %v32_v24, %v36_v25  ;;  %p148_p9 = pnand %p147_p8, %p141_p5 }
  0x17   :  { %v66_v10 = vadd.s32 %v65_v7, %v62_v8  ;;  %v67_v11 = vadd.s32 %v65_v7, %v63_v9  ;;  %v44_v36 = vrot.slane %v37_v30, %v43_v31 }
  0x19   :  { %v68_v12 = vshrl.u32 %v66_v10, 16  ;;  %v69_v13 = vshrl.u32 %v67_v11, 16  ;;  %v46_v43 = vadd.f32 %v44_v36, %v26_v39 }
  0x1b   :  { %v70_v18 = vxor.u32 %v68_v12, %v66_v10  ;;  %v71_v19 = vxor.u32 %v69_v13, %v67_v11 }
  0x1d   :  { %v72_v21 = vmul.u32 2146121005, %v70_v18  ;;  %v73_v22 = vmul.u32 2146121005, %v71_v19 }
  0x1f   :  { %v74_v26 = vshrl.u32 %v72_v21, 15  ;;  %v75_v27 = vshrl.u32 %v73_v22, 15 }
  0x21   :  { %v76_v28 = vxor.u32 %v74_v26, %v72_v21  ;;  %v77_v29 = vxor.u32 %v75_v27, %v73_v22 }
  0x23   :  { %v78_v32 = vmul.u32 2221713035, %v76_v28  ;;  %v79_v33 = vmul.u32 2221713035, %v77_v29 }
  0x25   :  { %v80_v34 = vshrl.u32 %v78_v32, 16  ;;  %v81_v35 = vshrl.u32 %v79_v33, 16 }
  0x27   :  { %v82_v37 = vxor.u32 %v80_v34, %v78_v32  ;;  %v83_v38 = vxor.u32 %v81_v35, %v79_v33 }
  0x29   :  { %vm84_vm0 = vcmp.lt.u32.totalorder %v82_v37, 3865470566  ;;  %vm85_vm1 = vcmp.lt.u32.totalorder %v83_v38, 3865470566 }
  0x2a   :  { %v86_v41 = vsel %vm84_vm0, 1.1111112, %v166_v40  ;;  %v87_v42 = vsel %vm85_vm1, 1.1111112, %v166_v40 }
  0x2b   :  { %v90_v44 = vcombine.low %v86_v41, %v87_v42 }
  0x2d   :  { %v97_v45 = vrot.slane %v90_v44, %v43_v31 }
  0x2f   :  { %v99_v46 = vmul.f32 %v97_v45, %v46_v43 }
  0x31   :  { %100 = vst [vmem:[#allocation7] sm:$0xf] %v99_v46 }
  0x32   :  { %151 = shalt.err (!%p148_p9)
}
  0x33   :  { %110 = dma.vmem_to_hbm [thread:$0]  %s108_s2, 64, %s203_s3, [#allocation6]  }
  0x34   :  { %162 = dma.done.wait [#allocation6], 64  }
  0x35   :  { %163 = vsyncadd [#allocation6], 4294967232 }
  0x36   :  { %114 = vsyncpa [#allocation5], 1 }
  0x37   :  { %115 = vsyncpa [#allocation6], 1 }

</bundles_post_ra>
